<compile_context>
chip_gen: v7x
topology: tpu7x:2x2x1
jax: 0.10.0
libtpu: 0.0.40
codegen_flags: <defaults>
</compile_context>

<pallas_src>
import jax
import jax.numpy as jnp
from jax.experimental import pallas as pl
from jax.experimental.pallas import tpu as pltpu


def _transform_channels_kernel(ch_ref, x_ref, w_ref, b_ref, o_ref):
    # ch_ref (scalar prefetch) is only consumed by the index_maps.
    del ch_ref
    k = pl.program_id(1)            # position in the selected-channel list
    w = w_ref[k]                    # per-selected-channel affine params (SMEM scalars)
    b = b_ref[k]
    # Compute in f32 for parity with the PyTorch reference; the kernel is
    # HBM-bound so the cast cost is hidden.  (A bf16 compute path would be a
    # valid v6e/v7x-only micro-opt if bf16 tanh accuracy is acceptable.)
    x = x_ref[...].astype(jnp.float32)
    o_ref[...] = jnp.tanh(x * w + b).astype(o_ref.dtype)


def _largest_divisor_leq(n, cap):
    """Largest divisor of n that is <= cap (at least 1)."""
    d = max(1, min(n, cap))
    while d > 1 and n % d != 0:
        d -= 1
    return d


def _pick_row_tile(rows, lane, elem_bytes, sub_mult, max_block_bytes):
    """Tile size for the second-to-last (sublane) block axis.

    Guarantees the per-block byte count stays (approximately) under
    max_block_bytes even when `rows` has no convenient divisor: if no aligned
    divisor fits, a fixed aligned cap is used and the ragged tail block is
    handled by a cdiv grid + Pallas edge masking."""
    max_rows = max(1, max_block_bytes // (lane * elem_bytes))
    if rows <= max_rows:
        return rows                       # full extent -> always layout-legal
    cap = (max_rows // sub_mult) * sub_mult
    if cap < sub_mult:
        return min(rows, sub_mult)        # extreme edge case; stays layout-legal
    t = cap
    while t >= sub_mult:
        if rows % t == 0:
            return t                      # aligned divisor: no ragged tail
        t -= sub_mult
    return cap                            # aligned cap; ragged tail masked


def tfms_transform_channels(x, channels, weight, bias, *,
                            max_block_bytes=2 * 1024 * 1024):
    """x: (N, C, H, W); channels: 1-D int array of selected channel ids
    (assumed unique); weight/bias: per-selected-channel affine params
    (len == len(channels)).

    Caller contract: donate `x` (e.g. jax.jit(..., donate_argnums=0)) so the
    output can alias the input buffer; otherwise XLA inserts a defensive full
    copy and the pass-through-channel traffic saving is lost (semantics are
    unchanged either way)."""
    N, C, H, W = x.shape
    channels = jnp.asarray(channels, dtype=jnp.int32)
    weight = jnp.asarray(weight, dtype=jnp.float32)
    bias = jnp.asarray(bias, dtype=jnp.float32)
    K = channels.shape[0]
    HW = H * W

    elem_bytes = x.dtype.itemsize
    sub_mult = 8 * max(1, 4 // elem_bytes)     # 8 (f32) / 16 (bf16) / 32 (int8)

    if HW % 128 == 0:
        # Lane-dense layout: flatten spatial to (rows, 128).  Row-major
        # reshape is a free relayout-less view of the same buffer.
        lane = 128
        rows = HW // 128
        x_r = x.reshape(N, C, rows, lane)
    else:
        # Fallback (HW has no factor of 128): keep (H, W); W rides the lanes
        # (masked stores when W < 128), H is tiled on sublanes under the same
        # VMEM cap.  # TODO(synk): a padded lane-dense path could trade one
        # extra full-tensor copy for unmasked stores when K is large.
        lane = W
        rows = H
        x_r = x

    row_tile = _pick_row_tile(rows, lane, elem_bytes, sub_mult, max_block_bytes)

    # Fold batch into the block while staying under the per-block budget
    # (only kicks in when the per-channel spatial tile is small).
    per_batch_bytes = row_tile * lane * elem_bytes
    batch_tile = _largest_divisor_leq(N, max(1, max_block_bytes // per_batch_bytes))

    grid = (N // batch_tile, K, pl.cdiv(rows, row_tile))
    block = (batch_tile, 1, row_tile, lane)
    # `channels` is scalar-prefetched into SMEM and consumed by the index
    # maps: the gather/scatter over selected channels lives entirely here.
    data_map = lambda n, k, s, ch: (n, ch[k], s, 0)
    smem_spec = pl.BlockSpec(memory_space=pltpu.MemorySpace.SMEM)

    out = pl.pallas_call(
        _transform_channels_kernel,
        out_shape=jax.ShapeDtypeStruct(x_r.shape, x_r.dtype),
        grid_spec=pltpu.PrefetchScalarGridSpec(
            num_scalar_prefetch=1,            # `channels` -> SMEM, fed to index_maps
            grid=grid,
            in_specs=[
                pl.BlockSpec(block, data_map),   # gathered selected-channel tile
                smem_spec,                       # weight (K,) in SMEM
                smem_spec,                       # bias   (K,) in SMEM
            ],
            out_specs=pl.BlockSpec(block, data_map),   # scatter back in place
        ),
        # Flat input index 1 (= x_r, after the scalar-prefetch `channels`)
        # aliases output 0: untouched (pass-through) channels keep their values.
        input_output_aliases={1: 0},
        # No accumulator; every grid point writes a disjoint block -> all axes
        # parallel so megacore (v7x) can shard K / spatial even when N == 1.
        compiler_params=pltpu.CompilerParams(
            dimension_semantics=("parallel", "parallel", "parallel")),
    )(channels, x_r, weight, bias)

    return out.reshape(N, C, H, W)


def _reference(x, channels, weight, bias):
    # Pure-JAX reference mirroring the PyTorch forward semantics.
    channels = jnp.asarray(channels, dtype=jnp.int32)
    sel = x[:, channels]                                           # data[:, self.channels]
    transformed = jnp.tanh(sel * weight[None, :, None, None]
                           + bias[None, :, None, None])            # self.transforms(...)
    return x.at[:, channels].set(transformed)                      # clone + write-back


if __name__ == "__main__":
    key = jax.random.PRNGKey(0)
    N, C, H, W = 2, 4, 16, 16
    x = jax.random.normal(key, (N, C, H, W), dtype=jnp.float32)

    channels = jnp.array([1, 3], dtype=jnp.int32)
    k = channels.shape[0]
    # Deterministic synthetic parameters for the inner transform.
    weight = 0.5 + 0.25 * jnp.arange(k, dtype=jnp.float32)
    bias = 0.1 * jnp.arange(k, dtype=jnp.float32)

    ref = _reference(x, channels, weight, bias)
    ref = jax.block_until_ready(ref)

    # Donate x so the aliased output really reuses the input HBM buffer
    # (x is not used again below).
    run = jax.jit(tfms_transform_channels, donate_argnums=(0,))
    out = run(x, channels, weight, bias)
    out = jax.block_until_ready(out)

    assert jnp.allclose(out, ref, atol=1e-5, rtol=1e-5), "mismatch vs reference"
    print("KERNEL_OK")
</pallas_src>

<mosaic_0001>
module attributes {stable_mosaic.version = 11 : i64} {
  func.func @_transform_channels_kernel(%arg0: i32, %arg1: i32, %arg2: i32, %arg3: memref<2xi32, #tpu.memory_space<smem>>, %arg4: memref<2x1x2x128xf32, #tpu.memory_space<vmem>>, %arg5: memref<2xf32, #tpu.memory_space<smem>>, %arg6: memref<2xf32, #tpu.memory_space<smem>>, %arg7: memref<2x1x2x128xf32, #tpu.memory_space<vmem>>) attributes {dimension_semantics = [#tpu.dimension_semantics<parallel>, #tpu.dimension_semantics<parallel>, #tpu.dimension_semantics<parallel>], iteration_bounds = array<i64: 1, 2, 1>, scalar_prefetch = 1 : i64, scratch_operands = 0 : i64, tpu.core_type = #tpu.core_type<tc>, window_params = [{transform_indices = @transform_0, window_bounds = array<i64: 2, 1, 2, 128>}, {transform_indices = @transform_1, window_bounds = array<i64: 2>}, {transform_indices = @transform_2, window_bounds = array<i64: 2>}, {transform_indices = @transform_3, window_bounds = array<i64: 2, 1, 2, 128>}]} {
    %0 = arith.index_cast %arg1 : i32 to index
    %1 = memref.load %arg5[%0] : memref<2xf32, #tpu.memory_space<smem>>
    %2 = arith.index_cast %arg1 : i32 to index
    %3 = memref.load %arg6[%2] : memref<2xf32, #tpu.memory_space<smem>>
    %c0 = arith.constant 0 : index
    %c0_0 = arith.constant 0 : index
    %c0_1 = arith.constant 0 : index
    %c0_2 = arith.constant 0 : index
    %4 = vector.load %arg4[%c0, %c0_0, %c0_1, %c0_2] : memref<2x1x2x128xf32, #tpu.memory_space<vmem>>, vector<2x1x2x128xf32>
    %5 = vector.broadcast %1 : f32 to vector<2x1x2x128xf32>
    %6 = arith.mulf %4, %5 : vector<2x1x2x128xf32>
    %7 = vector.broadcast %3 : f32 to vector<2x1x2x128xf32>
    %8 = arith.addf %6, %7 : vector<2x1x2x128xf32>
    %9 = math.tanh %8 : vector<2x1x2x128xf32>
    %c0_3 = arith.constant 0 : index
    %c0_4 = arith.constant 0 : index
    %c0_5 = arith.constant 0 : index
    %c0_6 = arith.constant 0 : index
    %10 = vector.load %arg7[%c0_3, %c0_4, %c0_5, %c0_6] : memref<2x1x2x128xf32, #tpu.memory_space<vmem>>, vector<2x1x2x128xf32>
    tpu.vector_store %arg7[%c0_3, %c0_4, %c0_5, %c0_6], %9 {strides = array<i32>} : memref<2x1x2x128xf32, #tpu.memory_space<vmem>>, vector<2x1x2x128xf32>,
    return
  }
  func.func @transform_0(%arg0: i32, %arg1: i32, %arg2: i32, %arg3: memref<2xi32, #tpu.memory_space<smem>>) -> (i32, i32, i32, i32) {
    %0 = arith.index_cast %arg1 : i32 to index
    %1 = memref.load %arg3[%0] : memref<2xi32, #tpu.memory_space<smem>>
    %c0_i32 = arith.constant 0 : i32
    %c0_i32_0 = arith.constant 0 : i32
    return %arg0, %1, %arg2, %c0_i32 : i32, i32, i32, i32
  }
  func.func @transform_1(%arg0: i32, %arg1: i32, %arg2: i32, %arg3: memref<2xi32, #tpu.memory_space<smem>>) -> i32 {
    %c0_i32 = arith.constant 0 : i32
    %c0_i32_0 = arith.constant 0 : i32
    return %c0_i32 : i32
  }
  func.func @transform_2(%arg0: i32, %arg1: i32, %arg2: i32, %arg3: memref<2xi32, #tpu.memory_space<smem>>) -> i32 {
    %c0_i32 = arith.constant 0 : i32
    %c0_i32_0 = arith.constant 0 : i32
    return %c0_i32 : i32
  }
  func.func @transform_3(%arg0: i32, %arg1: i32, %arg2: i32, %arg3: memref<2xi32, #tpu.memory_space<smem>>) -> (i32, i32, i32, i32) {
    %0 = arith.index_cast %arg1 : i32 to index
    %1 = memref.load %arg3[%0] : memref<2xi32, #tpu.memory_space<smem>>
    %c0_i32 = arith.constant 0 : i32
    %c0_i32_0 = arith.constant 0 : i32
    return %arg0, %1, %arg2, %c0_i32 : i32, i32, i32, i32
  }
}

</mosaic_0001>

<bundles_post_ra>
// kernel: tfms_transform_channels.1
= control target key start
LH: loop header
LB: loop body
LE: loop exit
PB: predicated region body
PF: predicated region fallthrough
CT: control target
= control target key end

     0   :  { %s816_s0 = inlined_call_operand.vmem [shape: s32[2], index: 0, kind: input, shape index: {}]   ;;  %s817_s1 = inlined_call_operand.vmem [shape: f32[2,4,2,128], index: 1, kind: input, shape index: {}, may-alias: {1,4}]   ;;  %s818_s2 = inlined_call_operand.vmem [shape: f32[2], index: 2, kind: input, shape index: {}]   ;;  %s819_s3 = inlined_call_operand.vmem [shape: f32[2], index: 3, kind: input, shape index: {}]   ;;  %s820_s4 = inlined_call_operand.vmem [shape: f32[2,4,2,128], index: 4, kind: output, shape index: {}, may-alias: {1,4}]  }
   0x1   :  { %s9_s17 = sshll.u32 %s816_s0, 4  ;;  %s10_s17 = int_to_ptr.vmem [resolvable:$true] %s9_s17 }
   0x2   :  { %s534_s18 = scalar_lea.vmem %s10_s17, 16  ;;  %p539_p1 = scmp.lt.s32.totalorder %s10_s17, %s10_s17 }
   0x3   :  { %p535_p0 = scmp.ne.s32.totalorder %s10_s17, %s534_s18  ;;  %p540_p2 = scmp.lt.s32.totalorder %s534_s18, %s534_s18 }
   0x5   :  { %p541_p3 = por %p540_p2, %p539_p1 }
   0x7   :  { %p542_p4 = pnand %p541_p3, %p535_p0 }
   0x9   :  { %545 = shalt.err (!%p542_p4)  }
   0xa   :  { %s642_s19 = smov [#allocation3]  }
   0xb   :  { %12 = dma.vmem_to_smem %s10_s17, 16, %s642_s19, [#allocation2] }
   0xc   :  { %604 = dma.done.wait [#allocation2], 16 }
   0xd   :  { %605 = vsyncadd [#allocation2], 4294967280 }
   0xe   :  { %14 = sfence }
   0xf   :  { %15 = vsyncpa [#allocation6], 0 }
  0x10   :  { %16 = vsyncpa [#allocation8], 0  ;;  %s673_s20 = smov 0   ;;  %s675_s21 = smov 0  }
  0x11   :  { %s677_s0 = smov 0   ;;  %s679_s22 = smov 0  }
  0x12   :  { %s681_s23 = smov 0   ;;  %s683_s24 = smov 0  }
  0x13   :  { %s685_s25 = smov 0  }
  0x14 LB: > { %s435_s26 = sadd.s32 4294967295, %s640_s25   ;;  %s37_s27 = sadd.s32 1, %s636_s24  ;;  %s640_s25 = sphi %s685_s25, %s22_s25   ;;  %s636_s24 = sphi %s683_s24, %s838_s24   ;;  %s632_s23 = sphi %s681_s23, %s837_s23   ;;  %s628_s22 = sphi %s679_s22, %s836_s22   ;;  %s624_s0 = sphi %s677_s0, %s835_s0   ;;  %s620_s21 = sphi %s675_s21, %s834_s21   ;;  %s616_s20 = sphi %s673_s20, %s833_s20  }
  0x15   : > { %p39_p5 = scmp.ge.s32.totalorder %s37_s27, 2  ;;  %s45_s28 = sld [smem:[#allocation3 + %s636_s24]] }
  0x16   : > { %s54_s29 = sadd.s32 1, %s628_s22  ;;  %p61_p6 = scmp.ne.s32.totalorder %s628_s22, %s624_s0 }
  0x17   : > { %s840_s27 = smov (%p39_p5, %s37_s27), 0  ;;  %p62_p7 = scmp.eq.s32.totalorder %s640_s25, 0 }
  0x18   : > { %s119_s30 = sld [smem:[#allocation3 + %s636_s24]]  ;;  %s128_s8 = sadd.s32 1, %s620_s21 }
  0x19   : > { %s46_s5 = sld [smem:[#allocation3 + %s840_s27]]  ;;  %p720_p8 = por %p62_p7, %p61_p6 }
  0x1a   : > { %s120_s6 = sld [smem:[#allocation3 + %s840_s27]]  ;;  %p138_p9 = scmp.ne.s32.totalorder %s620_s21, %s616_s20 }
  0x1b   : > { %s824_s7 = scalar_select %p720_p8, 1, 0 }
  0x1c   : > { %p139_p10 = scmp.eq.s32.totalorder %s435_s26, 1  ;;  %p437_p11 = scmp.ge.s32.totalorder %s640_s25, 1 }
  0x1d   : > { %p152_p12 = scmp.lt.s32.totalorder %s640_s25, 3  ;;  %p737_p1 = scmp.eq.s32.totalorder %s435_s26, 0 }
  0x1e   : > { %p729_p13 = por %p139_p10, %p138_p9  ;;  %s165_s16 = sshll.u32 %s818_s2, 4  ;;  %s166_s16 = int_to_ptr.vmem [resolvable:$true] %s165_s16 }
  0x1f   : > { %p733_p0 = pnand %p437_p11, %p152_p12  ;;  %s48_s12 = ssub.s32 %s45_s28, %s46_s5 }
  0x20   : > { %s825_s9 = scalar_select %p729_p13, 1, 0 }
  0x21   : > { %s826_s10 = scalar_select %p733_p0, 1, 0 }
  0x22   : > { %s827_s11 = scalar_select %p737_p1, 1, 0 }
  0x23   : > { %s122_s13 = ssub.s32 %s119_s30, %s120_s6  ;;  %p52_p2 = scmp.eq.s32.totalorder %s48_s12, 0 }
  0x24   : > { %p126_p3 = scmp.eq.s32.totalorder %s122_s13, 0  ;;  %p460_p4 = pneg %p733_p0 }
  0x25   : > { %s747_s17 = scalar_select %p52_p2, %s628_s22, %s54_s29  }
  0x26   : > { %s750_s18 = scalar_select %p126_p3, %s620_s21, %s128_s8  }
  0x27   : > { %p754_p5 = pnand %p737_p1, %p460_p4  ;;  %s176_s30 = sshll.u32 %s819_s3, 4  ;;  %s177_s30 = int_to_ptr.vmem [resolvable:$true] %s176_s30 }
  0x28   : > { %s546_s5 = scalar_lea.vmem %s166_s16, 16  ;;  %p554_p11 = scmp.lt.s32.totalorder %s166_s16, %s166_s16 }
  0x29   : > { %p547_p6 = scmp.ne.s32.totalorder %s166_s16, %s546_s5  ;;  %p548_p7 = pneg %p754_p5 }
  0x2a   : > { %p555_p12 = scmp.lt.s32.totalorder %s546_s5, %s546_s5 }
  0x2b   : > { %p549_p9 = pnand %p548_p7, %p547_p6 }
  0x2c   : > { %p556_p2 = por %p555_p12, %p554_p11 }
  0x2d   : > { %p550_p10 = pneg %p549_p9 }
  0x2f   : > { %p557_p3 = pnand %p556_p2, %p550_p10 }
  0x31   : > { %560 = shalt.err (!%p557_p3)
}
  0x32   : > { %s643_s29 = smov [#allocation5]   ;;  %s561_s6 = scalar_lea.vmem %s177_s30, 16 }
  0x33   : > { %463 = dma.vmem_to_smem (!%p754_p5), %s166_s16, 16, %s643_s29, [#allocation6]  }
  0x34   : > { %p562_p4 = scmp.ne.s32.totalorder %s177_s30, %s561_s6  ;;  %p569_p0 = scmp.lt.s32.totalorder %s177_s30, %s177_s30 }
  0x35   : > { %p570_p8 = scmp.lt.s32.totalorder %s561_s6, %s561_s6 }
  0x36   : > { %p564_p13 = pnand %p562_p4, %p548_p7 }
  0x37   : > { %p571_p6 = por %p570_p8, %p569_p0 }
  0x38   : > { %p565_p1 = pneg %p564_p13 }
  0x3a   : > { %p572_p9 = pnand %p571_p6, %p565_p1 }
  0x3c   : > { %575 = shalt.err (!%p572_p9)
}
  0x3d   : > { %s644_s8 = smov [#allocation7]   ;;  %p440_p10 = scmp.ge.s32.totalorder %s640_s25, 2 }
  0x3e   : > { %466 = dma.vmem_to_smem (!%p754_p5), %s177_s30, 16, %s644_s8, [#allocation8]  }
  0x3f   : > { %183 = sbr.rel (%p440_p10) target bundleno = 81 (0x51), region = 24  ;;  %p829_p11 = scmp.ne.s32.totalorder (!%p440_p10), %s824_s7, 0 }
  0x46   : > { %186 = sbr.rel (!%p829_p11) target bundleno = 81 (0x51), region = 28  ;;  %s188_s12 = sand.u32 (%p829_p11), 1, %s628_s22  }
  0x47   : > { %s191_s13 = sld [smem:[#allocation3 + %s636_s24]] (%p829_p11)  ;;  %s441_s14 = sshll.u32 (%p829_p11), %s188_s12, 2 }
  0x48   : > { %s190_s19 = scalar_lea.vmem (%p829_p11), [#allocation4], %s441_s14 }
  0x4d   : > { %s442_s15 = sshll.u32 %s191_s13, 1 }
  0x4e   : > { %s197_s28 = scalar_lea.vmem %s817_s1, %s442_s15 }
  0x4f   : > { %v213_v0 = vld [vmem:[%s197_s28] sm:$0x3]  ;;  %v215_v1 = vld [vmem:[%s197_s28 + $0x8] sm:$0x3] }
  0x50   : > { %214 = vst [vmem:[%s190_s19] sm:$0x3] %v213_v0  ;;  %216 = vst [vmem:[%s190_s19 + $0x2] sm:$0x3] %v215_v1 }
  0x51 PF: > { %p830_p8 = scmp.ne.s32.totalorder %s826_s10, 0 }
  0x52   : > { %s241_s7 = sand.u32 (!%p830_p8), 1, %s624_s0   ;;  %p831_p13 = scmp.ne.s32.totalorder (!%p830_p8), %s827_s11, 0 }
  0x53   : > { %238 = sbr.rel (%p830_p8) target bundleno = 127 (0x7f), region = 62  ;;  %s444_s30 = sshll.u32 (!%p830_p8), %s241_s7, 2 }
  0x54   : > { %s243_s5 = scalar_lea.vmem (!%p830_p8), [#allocation4], %s444_s30 }
  0x5a   : > { %607 = dma.done.wait (%p831_p13), [#allocation6], 16  }
  0x5b   : > { %609 = vsyncadd (%p831_p13), [#allocation6], 4294967280 }
  0x5c   : > { %611 = dma.done.wait (%p831_p13), [#allocation8], 16  }
  0x5d   : > { %613 = vsyncadd (%p831_p13), [#allocation8], 4294967280 }
  0x5e   : > { %255 = sfence }
  0x5f   : > { %s276_s10 = sld [smem:[#allocation5 + %s632_s23]]  ;;  %v278_v2 = vld [vmem:[%s243_s5] sm:$0x3]  ;;  %v279_v3 = vld [vmem:[%s243_s5 + $0x2] sm:$0x3]  ;;  %s269_s0 = sand.u32 1, %s616_s20  }
  0x60   : > { %s277_s29 = sld [smem:[#allocation7 + %s632_s23]]  ;;  %s447_s6 = sshll.u32 %s269_s0, 2 }
  0x61   : > { %s271_s11 = scalar_lea.vmem [#allocation9], %s447_s6  ;;  %p832_p0 = scmp.ne.s32.totalorder %s825_s9, 0 }
  0x62   : > { %s297_s8 = sld [smem:[#allocation3 + %s632_s23]] (%p832_p0) }
  0x65   : > { %v280_v4 = vstv %s276_s10 }
  0x66   : > { %v281_v5 = vmul.f32 %v280_v4, %v278_v2  ;;  %v283_v6 = vstv %s277_s29  ;;  %v282_v7 = vmul.f32 %v280_v4, %v279_v3 }
  0x68   : > { %v284_v8 = vadd.f32 %v283_v6, %v281_v5  ;;  %v285_v9 = vadd.f32 %v283_v6, %v282_v7  ;;  %s449_s12 = sshll.u32 (%p832_p0), %s297_s8, 1 }
  0x69   : > { %s303_s15 = scalar_lea.vmem (%p832_p0), %s820_s4, %s449_s12 }
  0x6a   : > { %530 = vtanh.f32 %v284_v8 }
  0x6b   : > { %532 = vtanh.f32 %v285_v9 }
  0x70   : > { %296 = sbr.rel (!%p832_p0) target bundleno = 127 (0x7f), region = 78 }
  0x74   : > { %v531_v10 = vpop.eup %530 }
  0x75   : > { %v533_v11 = vpop.eup %532  ;;  %288 = vst [vmem:[%s271_s11] sm:$0x3] %v531_v10 }
  0x76   : > { %289 = vst [vmem:[%s271_s11 + $0x2] sm:$0x3] %v533_v11 }
  0x7c   : > { %v319_v12 = vld [vmem:[%s271_s11] sm:$0x3] }
  0x7d   : > { %v321_v13 = vld [vmem:[%s271_s11 + $0x2] sm:$0x3]  ;;  %320 = vst [vmem:[%s303_s15] sm:$0x3] %v319_v12 }
  0x7e   : > { %322 = vst [vmem:[%s303_s15 + $0x8] sm:$0x3] %v321_v13 }
  0x7f PF: > { %s22_s25 = sadd.s32 1, %s640_s25   ;;  %s833_s20 = smov %s620_s21 }
  0x80   : > { %p19_p1 = scmp.ge.s32.totalorder %s22_s25, 4   ;;  %s834_s21 = smov %s750_s18 }
  0x81   : > { %s835_s0 = smov %s628_s22  ;;  %s836_s22 = smov %s747_s17 }
  0x82   : > { %s837_s23 = smov %s636_s24  ;;  %s838_s24 = smov %s840_s27 }
  0x83   :  { %21 = sbr.rel (!%p19_p1) target bundleno = 20 (0x14), region = 144 }
  0x8a   :  { %351 = vsyncpa [#allocation6], 1 }
  0x8b   :  { %353 = vsyncpa [#allocation6 + $0x1], 1 }
  0x8c   :  { %354 = vsyncpa [#allocation8], 1 }

</bundles_post_ra>
